<compile_context>
chip_gen: v7x
topology: tpu7x:2x2x1
jax: 0.10.0
libtpu: 0.0.40
codegen_flags: <defaults>
</compile_context>

<pallas_src>
import functools

import jax
import jax.numpy as jnp
from jax import lax
from jax.experimental import pallas as pl
from jax.experimental.pallas import tpu as pltpu


# ----------------------------- fused FairAC kernel -----------------------------------
def _fairac_kernel(
    bias_ref,       # (Nd, Ns)  f32
    emb_dest_ref,   # (Nd, E)   f32
    emb_src_ref,    # (Ns, E)   f32
    feat_src_ref,   # (Ns, Fd)  f32
    fc_w_ref,       # (Fd, T)   f32
    fc_b_ref,       # (1, T)    f32
    cls_w_ref,      # (T, 1)    f32
    cls_b_ref,      # (1, 1)    f32
    w_all_ref,      # (E, H*A)  f32   heads stacked along the lane axis
    w2_ref,         # (H, A, A) f32
    re_ref,         # out: (Nd, T) feature_src_re
    label_ref,      # out: (Ns, 1) label_hat
    tf_ref,         # out: (Ns, T) transformed_features
    tf_vmem,        # scratch: (Ns, T) f32  -- VMEM-resident transformed features
    *,
    num_heads,
    attn_dim,
):
    f32 = jnp.float32
    bf16 = jnp.bfloat16

    def mm(a, b):
        # MXU matmul: bf16 operands, f32 accumulation.
        return jnp.dot(a.astype(bf16), b.astype(bf16), preferred_element_type=f32)

    # ---- fc: transformed features, kept in VMEM (never re-read from HBM) ----
    tf = mm(feat_src_ref[...], fc_w_ref[...]) + fc_b_ref[...]
    tf_vmem[...] = tf
    tf_ref[...] = tf

    # ---- classifier head on transformed features ----
    label_ref[...] = mm(tf, cls_w_ref[...]) + cls_b_ref[...]

    # ---- additive attention mask, computed ONCE for all heads ----
    mask = jnp.where(bias_ref[...] > 0, f32(0.0), f32(-9e15))   # (Nd, Ns)

    # ---- batched per-head projections: one matmul over all heads ----
    h_src = mm(emb_src_ref[...], w_all_ref[...])    # (Ns, H*A)
    h_dst = mm(emb_dest_ref[...], w_all_ref[...])   # (Nd, H*A)

    acc = jnp.zeros(re_ref.shape, f32)
    for h in range(num_heads):                       # static unroll, H is small
        lo = h * attn_dim
        h1 = h_src[:, lo:lo + attn_dim]              # (Ns, A)
        h2 = h_dst[:, lo:lo + attn_dim]              # (Nd, A)
        h2w2 = mm(h2, w2_ref[h])                     # (Nd, A)

        # logits = h2w2 @ h1.T  -- contract last dims directly, no transpose materialized.
        logits = lax.dot_general(
            h2w2.astype(bf16), h1.astype(bf16),
            dimension_numbers=(((1,), (1,)), ((), ())),
            preferred_element_type=f32,
        )                                            # (Nd, Ns)

        e = jnp.where(logits > 0, logits, 0.2 * logits)          # LeakyReLU(0.2)
        att = e + mask                                            # additive mask (f32)
        att = jnp.exp(att - jnp.max(att, axis=-1, keepdims=True))  # stable softmax
        att = att * pl.reciprocal(jnp.sum(att, axis=-1, keepdims=True), approx=True)

        hp = mm(att, tf_vmem[...])                                # (Nd, T)
        acc = acc + jnp.where(hp > 0, hp, jnp.exp(hp) - 1.0)      # ELU

    re_ref[...] = acc * (1.0 / num_heads)             # single final head-mean scale


# ----------------------------- FairACGAN forward -------------------------------------
def fairac_forward(params, bias, emb_dest, emb_src, feature_src):
    """Returns (feature_src_re, label_hat, transformed_features)."""
    Nd, Ns = bias.shape
    E = emb_src.shape[1]
    Fd = feature_src.shape[1]
    T = params["fc_w"].shape[1]
    H, _, A = params["attn_W"].shape

    # Stack heads along the lane axis so both projections are one wide matmul.
    w_all = jnp.transpose(params["attn_W"], (1, 0, 2)).reshape(E, H * A)

    kernel = functools.partial(_fairac_kernel, num_heads=H, attn_dim=A)

    out_shape = (
        jax.ShapeDtypeStruct((Nd, T), jnp.float32),   # feature_src_re
        jax.ShapeDtypeStruct((Ns, 1), jnp.float32),   # label_hat
        jax.ShapeDtypeStruct((Ns, T), jnp.float32),   # transformed_features
    )

    return pl.pallas_call(
        kernel,
        out_shape=out_shape,
        in_specs=[
            pl.BlockSpec((Nd, Ns), lambda: (0, 0)),      # bias
            pl.BlockSpec((Nd, E), lambda: (0, 0)),       # emb_dest
            pl.BlockSpec((Ns, E), lambda: (0, 0)),       # emb_src
            pl.BlockSpec((Ns, Fd), lambda: (0, 0)),      # feature_src
            pl.BlockSpec((Fd, T), lambda: (0, 0)),       # fc_w
            pl.BlockSpec((1, T), lambda: (0, 0)),        # fc_b
            pl.BlockSpec((T, 1), lambda: (0, 0)),        # cls_w
            pl.BlockSpec((1, 1), lambda: (0, 0)),        # cls_b
            pl.BlockSpec((E, H * A), lambda: (0, 0)),    # batched attention W
            pl.BlockSpec((H, A, A), lambda: (0, 0, 0)),  # per-head W2
        ],
        out_specs=[
            pl.BlockSpec((Nd, T), lambda: (0, 0)),
            pl.BlockSpec((Ns, 1), lambda: (0, 0)),
            pl.BlockSpec((Ns, T), lambda: (0, 0)),
        ],
        scratch_shapes=[pltpu.VMEM((Ns, T), jnp.float32)],
    )(bias, emb_dest, emb_src, feature_src,
      params["fc_w"], params["fc_b"], params["cls_w"], params["cls_b"],
      w_all, params["attn_W2"])


# ----------------------------- reference (pure JAX) -----------------------------------
def fairac_ref(params, bias, emb_dest, emb_src, feature_src, mxu_dtype=jnp.bfloat16):
    """Pure-JAX reference. mxu_dtype=bfloat16 mirrors the kernel's MXU precision;
    mxu_dtype=float32 gives the exact PyTorch-equivalent math."""
    def mm(a, b):
        return jnp.dot(a.astype(mxu_dtype), b.astype(mxu_dtype),
                       preferred_element_type=jnp.float32)

    tf = mm(feature_src, params["fc_w"]) + params["fc_b"]
    label = mm(tf, params["cls_w"]) + params["cls_b"]

    outs = []
    for h in range(params["attn_W"].shape[0]):
        W, W2 = params["attn_W"][h], params["attn_W2"][h]
        h1 = mm(emb_src, W)
        h2 = mm(emb_dest, W)
        e = mm(mm(h2, W2), h1.T)
        e = jnp.where(e > 0, e, 0.2 * e)
        att = jnp.where(bias > 0, e, -9e15)
        att = jax.nn.softmax(att, axis=1)
        hp = mm(att, tf)
        outs.append(jnp.where(hp > 0, hp, jnp.exp(hp) - 1.0))
    feat_re = jnp.mean(jnp.stack(outs, 0), axis=0)
    return feat_re, label, tf


if __name__ == "__main__":
    # Small shapes consistent with the module.
    feature_dim = 32
    transformed_feature_dim = 16
    emb_dim = 32
    attn_vec_dim = 32
    num_heads = 2
    N_dest, N_src = 8, 16

    key = jax.random.PRNGKey(0)
    ks = jax.random.split(key, 10)

    def xavier(k, shape, gain):
        fan_in, fan_out = shape[-2], shape[-1]
        std = gain * (2.0 / (fan_in + fan_out)) ** 0.5
        return std * jax.random.normal(k, shape, dtype=jnp.float32)

    params = {
        # nn.Linear stores weight (out, in); we keep (in, out) so x @ W applies directly.
        "fc_w": xavier(ks[0], (feature_dim, transformed_feature_dim), 1.414),
        "fc_b": jnp.zeros((1, transformed_feature_dim), jnp.float32),
        "cls_w": xavier(ks[1], (transformed_feature_dim, 1), 1.414),
        "cls_b": jnp.zeros((1, 1), jnp.float32),
        "attn_W": xavier(ks[2], (num_heads, emb_dim, attn_vec_dim), 2.0 ** 0.5),
        "attn_W2": xavier(ks[3], (num_heads, attn_vec_dim, attn_vec_dim), 2.0 ** 0.5),
    }

    feature_src = jax.random.normal(ks[4], (N_src, feature_dim), dtype=jnp.float32)
    emb_src = jax.random.normal(ks[5], (N_src, emb_dim), dtype=jnp.float32)
    emb_dest = jax.random.normal(ks[6], (N_dest, emb_dim), dtype=jnp.float32)
    # adjacency-like bias: mostly nonzero so softmax rows are well defined
    bias = (jax.random.uniform(ks[7], (N_dest, N_src)) > 0.3).astype(jnp.float32)

    feat_re, label_hat, tf = jax.block_until_ready(
        jax.jit(fairac_forward)(params, bias, emb_dest, emb_src, feature_src)
    )

    # 1) Matched-precision reference (bf16 MXU operands, f32 accumulate) -- tight check.
    r_re, r_lab, r_tf = fairac_ref(params, bias, emb_dest, emb_src, feature_src,
                                   mxu_dtype=jnp.bfloat16)
    assert jnp.allclose(tf, r_tf, atol=2e-2, rtol=2e-2)
    assert jnp.allclose(label_hat, r_lab, atol=2e-2, rtol=2e-2)
    assert jnp.allclose(feat_re, r_re, atol=2e-2, rtol=2e-2)

    # 2) Full-f32 reference sanity check on the linear outputs (bounded bf16 error),
    #    plus finiteness of the attention output.
    f_re, f_lab, f_tf = fairac_ref(params, bias, emb_dest, emb_src, feature_src,
                                   mxu_dtype=jnp.float32)
    assert jnp.allclose(tf, f_tf, atol=1e-1, rtol=1e-1)
    assert jnp.allclose(label_hat, f_lab, atol=1e-1, rtol=1e-1)
    assert bool(jnp.all(jnp.isfinite(feat_re)))

    print("KERNEL_OK")
</pallas_src>

<mosaic_0001>
module attributes {stable_mosaic.version = 11 : i64} {
  func.func @_fairac_kernel(%arg0: memref<8x16xf32, #tpu.memory_space<vmem>>, %arg1: memref<8x32xf32, #tpu.memory_space<vmem>>, %arg2: memref<16x32xf32, #tpu.memory_space<vmem>>, %arg3: memref<16x32xf32, #tpu.memory_space<vmem>>, %arg4: memref<32x16xf32, #tpu.memory_space<vmem>>, %arg5: memref<1x16xf32, #tpu.memory_space<vmem>>, %arg6: memref<16x1xf32, #tpu.memory_space<vmem>>, %arg7: memref<1x1xf32, #tpu.memory_space<vmem>>, %arg8: memref<32x64xf32, #tpu.memory_space<vmem>>, %arg9: memref<2x32x32xf32, #tpu.memory_space<vmem>>, %arg10: memref<8x16xf32, #tpu.memory_space<vmem>>, %arg11: memref<16x1xf32, #tpu.memory_space<vmem>>, %arg12: memref<16x16xf32, #tpu.memory_space<vmem>>, %arg13: memref<16x16xf32, #tpu.memory_space<vmem>>) attributes {dimension_semantics = [], scalar_prefetch = 0 : i64, scratch_operands = 1 : i64, tpu.core_type = #tpu.core_type<tc>} {
    %c0 = arith.constant 0 : index
    %c0_0 = arith.constant 0 : index
    %0 = vector.load %arg3[%c0, %c0_0] : memref<16x32xf32, #tpu.memory_space<vmem>>, vector<16x32xf32>
    %c0_1 = arith.constant 0 : index
    %c0_2 = arith.constant 0 : index
    %1 = vector.load %arg4[%c0_1, %c0_2] : memref<32x16xf32, #tpu.memory_space<vmem>>, vector<32x16xf32>
    %2 = arith.truncf %0 : vector<16x32xf32> to vector<16x32xbf16>
    %3 = arith.truncf %1 : vector<32x16xf32> to vector<32x16xbf16>
    %cst = arith.constant dense<0.000000e+00> : vector<16x16xf32>
    %4 = tpu.matmul %2, %3, %cst {dimension_numbers = #tpu.dot_dimension_numbers<[1], [0], [0], [1], [0, 0, 1, 1], [], []>} : vector<16x32xbf16>, vector<32x16xbf16>, vector<16x16xf32> -> vector<16x16xf32>
    %c0_3 = arith.constant 0 : index
    %c0_4 = arith.constant 0 : index
    %5 = vector.load %arg5[%c0_3, %c0_4] : memref<1x16xf32, #tpu.memory_space<vmem>>, vector<1x16xf32>
    %6 = vector.broadcast %5 : vector<1x16xf32> to vector<16x16xf32>
    %7 = arith.addf %4, %6 : vector<16x16xf32>
    %c0_5 = arith.constant 0 : index
    %c0_6 = arith.constant 0 : index
    %8 = vector.load %arg13[%c0_5, %c0_6] : memref<16x16xf32, #tpu.memory_space<vmem>>, vector<16x16xf32>
    tpu.vector_store %arg13[%c0_5, %c0_6], %7 {strides = array<i32>} : memref<16x16xf32, #tpu.memory_space<vmem>>, vector<16x16xf32>,
    %c0_7 = arith.constant 0 : index
    %c0_8 = arith.constant 0 : index
    %9 = vector.load %arg12[%c0_7, %c0_8] : memref<16x16xf32, #tpu.memory_space<vmem>>, vector<16x16xf32>
    tpu.vector_store %arg12[%c0_7, %c0_8], %7 {strides = array<i32>} : memref<16x16xf32, #tpu.memory_space<vmem>>, vector<16x16xf32>,
    %c0_9 = arith.constant 0 : index
    %c0_10 = arith.constant 0 : index
    %10 = vector.load %arg6[%c0_9, %c0_10] : memref<16x1xf32, #tpu.memory_space<vmem>>, vector<16x1xf32>
    %11 = arith.truncf %7 : vector<16x16xf32> to vector<16x16xbf16>
    %12 = arith.truncf %10 : vector<16x1xf32> to vector<16x1xbf16>
    %cst_11 = arith.constant dense<0.000000e+00> : vector<16x1xf32>
    %13 = tpu.matmul %11, %12, %cst_11 {dimension_numbers = #tpu.dot_dimension_numbers<[1], [0], [0], [1], [0, 0, 1, 1], [], []>} : vector<16x16xbf16>, vector<16x1xbf16>, vector<16x1xf32> -> vector<16x1xf32>
    %c0_12 = arith.constant 0 : index
    %c0_13 = arith.constant 0 : index
    %14 = vector.load %arg7[%c0_12, %c0_13] : memref<1x1xf32, #tpu.memory_space<vmem>>, vector<1x1xf32>
    %15 = vector.broadcast %14 : vector<1x1xf32> to vector<16x1xf32>
    %16 = arith.addf %13, %15 : vector<16x1xf32>
    %c0_14 = arith.constant 0 : index
    %c0_15 = arith.constant 0 : index
    %17 = vector.load %arg11[%c0_14, %c0_15] : memref<16x1xf32, #tpu.memory_space<vmem>>, vector<16x1xf32>
    tpu.vector_store %arg11[%c0_14, %c0_15], %16 {strides = array<i32>} : memref<16x1xf32, #tpu.memory_space<vmem>>, vector<16x1xf32>,
    %c0_16 = arith.constant 0 : index
    %c0_17 = arith.constant 0 : index
    %18 = vector.load %arg0[%c0_16, %c0_17] : memref<8x16xf32, #tpu.memory_space<vmem>>, vector<8x16xf32>
    %cst_18 = arith.constant 0.000000e+00 : f32
    %19 = vector.broadcast %cst_18 : f32 to vector<8x16xf32>
    %20 = arith.cmpf ogt, %18, %19 : vector<8x16xf32>
    %cst_19 = arith.constant 0.000000e+00 : f32
    %cst_20 = arith.constant -9.000000e+15 : f32
    %21 = vector.broadcast %cst_19 : f32 to vector<8x16xf32>
    %22 = vector.broadcast %cst_20 : f32 to vector<8x16xf32>
    %23 = arith.select %20, %21, %22 : vector<8x16xi1>, vector<8x16xf32>
    %c0_21 = arith.constant 0 : index
    %c0_22 = arith.constant 0 : index
    %24 = vector.load %arg2[%c0_21, %c0_22] : memref<16x32xf32, #tpu.memory_space<vmem>>, vector<16x32xf32>
    %c0_23 = arith.constant 0 : index
    %c0_24 = arith.constant 0 : index
    %25 = vector.load %arg8[%c0_23, %c0_24] : memref<32x64xf32, #tpu.memory_space<vmem>>, vector<32x64xf32>
    %26 = arith.truncf %24 : vector<16x32xf32> to vector<16x32xbf16>
    %27 = arith.truncf %25 : vector<32x64xf32> to vector<32x64xbf16>
    %cst_25 = arith.constant dense<0.000000e+00> : vector<16x64xf32>
    %28 = tpu.matmul %26, %27, %cst_25 {dimension_numbers = #tpu.dot_dimension_numbers<[1], [0], [0], [1], [0, 0, 1, 1], [], []>} : vector<16x32xbf16>, vector<32x64xbf16>, vector<16x64xf32> -> vector<16x64xf32>
    %c0_26 = arith.constant 0 : index
    %c0_27 = arith.constant 0 : index
    %29 = vector.load %arg1[%c0_26, %c0_27] : memref<8x32xf32, #tpu.memory_space<vmem>>, vector<8x32xf32>
    %c0_28 = arith.constant 0 : index
    %c0_29 = arith.constant 0 : index
    %30 = vector.load %arg8[%c0_28, %c0_29] : memref<32x64xf32, #tpu.memory_space<vmem>>, vector<32x64xf32>
    %31 = arith.truncf %29 : vector<8x32xf32> to vector<8x32xbf16>
    %32 = arith.truncf %30 : vector<32x64xf32> to vector<32x64xbf16>
    %cst_30 = arith.constant dense<0.000000e+00> : vector<8x64xf32>
    %33 = tpu.matmul %31, %32, %cst_30 {dimension_numbers = #tpu.dot_dimension_numbers<[1], [0], [0], [1], [0, 0, 1, 1], [], []>} : vector<8x32xbf16>, vector<32x64xbf16>, vector<8x64xf32> -> vector<8x64xf32>
    %cst_31 = arith.constant 0.000000e+00 : f32
    %34 = vector.broadcast %cst_31 : f32 to vector<8x16xf32>
    %35 = vector.extract_strided_slice %28 {offsets = [0, 0], sizes = [16, 32], strides = [1, 1]} : vector<16x64xf32> to vector<16x32xf32>
    %36 = vector.extract_strided_slice %33 {offsets = [0, 0], sizes = [8, 32], strides = [1, 1]} : vector<8x64xf32> to vector<8x32xf32>
    %c0_32 = arith.constant 0 : index
    %c0_33 = arith.constant 0 : index
    %c0_34 = arith.constant 0 : index
    %37 = vector.load %arg9[%c0_32, %c0_33, %c0_34] : memref<2x32x32xf32, #tpu.memory_space<vmem>>, vector<1x32x32xf32>
    %38 = vector.shape_cast %37 : vector<1x32x32xf32> to vector<32x32xf32>
    %39 = arith.truncf %36 : vector<8x32xf32> to vector<8x32xbf16>
    %40 = arith.truncf %38 : vector<32x32xf32> to vector<32x32xbf16>
    %cst_35 = arith.constant dense<0.000000e+00> : vector<8x32xf32>
    %41 = tpu.matmul %39, %40, %cst_35 {dimension_numbers = #tpu.dot_dimension_numbers<[1], [0], [0], [1], [0, 0, 1, 1], [], []>} : vector<8x32xbf16>, vector<32x32xbf16>, vector<8x32xf32> -> vector<8x32xf32>
    %42 = arith.truncf %41 : vector<8x32xf32> to vector<8x32xbf16>
    %43 = arith.truncf %35 : vector<16x32xf32> to vector<16x32xbf16>
    %cst_36 = arith.constant dense<0.000000e+00> : vector<8x16xf32>
    %44 = tpu.matmul %42, %43, %cst_36 {dimension_numbers = #tpu.dot_dimension_numbers<[1], [1], [0], [0], [0, 0, 1, 0], [], []>} : vector<8x32xbf16>, vector<16x32xbf16>, vector<8x16xf32> -> vector<8x16xf32>
    %cst_37 = arith.constant 0.000000e+00 : f32
    %45 = vector.broadcast %cst_37 : f32 to vector<8x16xf32>
    %46 = arith.cmpf ogt, %44, %45 : vector<8x16xf32>
    %cst_38 = arith.constant 2.000000e-01 : f32
    %47 = vector.broadcast %cst_38 : f32 to vector<8x16xf32>
    %48 = arith.mulf %47, %44 : vector<8x16xf32>
    %49 = arith.select %46, %44, %48 : vector<8x16xi1>, vector<8x16xf32>
    %50 = arith.addf %49, %23 : vector<8x16xf32>
    %cst_39 = arith.constant dense<0xFF800000> : vector<8xf32>
    %51 = vector.multi_reduction <maximumf>, %50, %cst_39 [1] : vector<8x16xf32> to vector<8xf32>
    %52 = vector.shape_cast %51 : vector<8xf32> to vector<8x1xf32>
    %53 = vector.broadcast %52 : vector<8x1xf32> to vector<8x16xf32>
    %54 = arith.subf %50, %53 : vector<8x16xf32>
    %55 = math.exp %54 : vector<8x16xf32>
    %cst_40 = arith.constant dense<0.000000e+00> : vector<8xf32>
    %56 = vector.multi_reduction <add>, %55, %cst_40 [1] : vector<8x16xf32> to vector<8xf32>
    %57 = vector.shape_cast %56 : vector<8xf32> to vector<8x1xf32>
    %58 = tpu.reciprocal %57 {approx = true} : vector<8x1xf32> -> vector<8x1xf32>
    %59 = vector.broadcast %58 : vector<8x1xf32> to vector<8x16xf32>
    %60 = arith.mulf %55, %59 : vector<8x16xf32>
    %c0_41 = arith.constant 0 : index
    %c0_42 = arith.constant 0 : index
    %61 = vector.load %arg13[%c0_41, %c0_42] : memref<16x16xf32, #tpu.memory_space<vmem>>, vector<16x16xf32>
    %62 = arith.truncf %60 : vector<8x16xf32> to vector<8x16xbf16>
    %63 = arith.truncf %61 : vector<16x16xf32> to vector<16x16xbf16>
    %cst_43 = arith.constant dense<0.000000e+00> : vector<8x16xf32>
    %64 = tpu.matmul %62, %63, %cst_43 {dimension_numbers = #tpu.dot_dimension_numbers<[1], [0], [0], [1], [0, 0, 1, 1], [], []>} : vector<8x16xbf16>, vector<16x16xbf16>, vector<8x16xf32> -> vector<8x16xf32>
    %cst_44 = arith.constant 0.000000e+00 : f32
    %65 = vector.broadcast %cst_44 : f32 to vector<8x16xf32>
    %66 = arith.cmpf ogt, %64, %65 : vector<8x16xf32>
    %67 = math.exp %64 : vector<8x16xf32>
    %cst_45 = arith.constant 1.000000e+00 : f32
    %68 = vector.broadcast %cst_45 : f32 to vector<8x16xf32>
    %69 = arith.subf %67, %68 : vector<8x16xf32>
    %70 = arith.select %66, %64, %69 : vector<8x16xi1>, vector<8x16xf32>
    %71 = arith.addf %34, %70 : vector<8x16xf32>
    %72 = vector.extract_strided_slice %28 {offsets = [0, 32], sizes = [16, 32], strides = [1, 1]} : vector<16x64xf32> to vector<16x32xf32>
    %73 = vector.extract_strided_slice %33 {offsets = [0, 32], sizes = [8, 32], strides = [1, 1]} : vector<8x64xf32> to vector<8x32xf32>
    %c1 = arith.constant 1 : index
    %c0_46 = arith.constant 0 : index
    %c0_47 = arith.constant 0 : index
    %74 = vector.load %arg9[%c1, %c0_46, %c0_47] : memref<2x32x32xf32, #tpu.memory_space<vmem>>, vector<1x32x32xf32>
    %75 = vector.shape_cast %74 : vector<1x32x32xf32> to vector<32x32xf32>
    %76 = arith.truncf %73 : vector<8x32xf32> to vector<8x32xbf16>
    %77 = arith.truncf %75 : vector<32x32xf32> to vector<32x32xbf16>
    %cst_48 = arith.constant dense<0.000000e+00> : vector<8x32xf32>
    %78 = tpu.matmul %76, %77, %cst_48 {dimension_numbers = #tpu.dot_dimension_numbers<[1], [0], [0], [1], [0, 0, 1, 1], [], []>} : vector<8x32xbf16>, vector<32x32xbf16>, vector<8x32xf32> -> vector<8x32xf32>
    %79 = arith.truncf %78 : vector<8x32xf32> to vector<8x32xbf16>
    %80 = arith.truncf %72 : vector<16x32xf32> to vector<16x32xbf16>
    %cst_49 = arith.constant dense<0.000000e+00> : vector<8x16xf32>
    %81 = tpu.matmul %79, %80, %cst_49 {dimension_numbers = #tpu.dot_dimension_numbers<[1], [1], [0], [0], [0, 0, 1, 0], [], []>} : vector<8x32xbf16>, vector<16x32xbf16>, vector<8x16xf32> -> vector<8x16xf32>
    %cst_50 = arith.constant 0.000000e+00 : f32
    %82 = vector.broadcast %cst_50 : f32 to vector<8x16xf32>
    %83 = arith.cmpf ogt, %81, %82 : vector<8x16xf32>
    %cst_51 = arith.constant 2.000000e-01 : f32
    %84 = vector.broadcast %cst_51 : f32 to vector<8x16xf32>
    %85 = arith.mulf %84, %81 : vector<8x16xf32>
    %86 = arith.select %83, %81, %85 : vector<8x16xi1>, vector<8x16xf32>
    %87 = arith.addf %86, %23 : vector<8x16xf32>
    %cst_52 = arith.constant dense<0xFF800000> : vector<8xf32>
    %88 = vector.multi_reduction <maximumf>, %87, %cst_52 [1] : vector<8x16xf32> to vector<8xf32>
    %89 = vector.shape_cast %88 : vector<8xf32> to vector<8x1xf32>
    %90 = vector.broadcast %89 : vector<8x1xf32> to vector<8x16xf32>
    %91 = arith.subf %87, %90 : vector<8x16xf32>
    %92 = math.exp %91 : vector<8x16xf32>
    %cst_53 = arith.constant dense<0.000000e+00> : vector<8xf32>
    %93 = vector.multi_reduction <add>, %92, %cst_53 [1] : vector<8x16xf32> to vector<8xf32>
    %94 = vector.shape_cast %93 : vector<8xf32> to vector<8x1xf32>
    %95 = tpu.reciprocal %94 {approx = true} : vector<8x1xf32> -> vector<8x1xf32>
    %96 = vector.broadcast %95 : vector<8x1xf32> to vector<8x16xf32>
    %97 = arith.mulf %92, %96 : vector<8x16xf32>
    %c0_54 = arith.constant 0 : index
    %c0_55 = arith.constant 0 : index
    %98 = vector.load %arg13[%c0_54, %c0_55] : memref<16x16xf32, #tpu.memory_space<vmem>>, vector<16x16xf32>
    %99 = arith.truncf %97 : vector<8x16xf32> to vector<8x16xbf16>
    %100 = arith.truncf %98 : vector<16x16xf32> to vector<16x16xbf16>
    %cst_56 = arith.constant dense<0.000000e+00> : vector<8x16xf32>
    %101 = tpu.matmul %99, %100, %cst_56 {dimension_numbers = #tpu.dot_dimension_numbers<[1], [0], [0], [1], [0, 0, 1, 1], [], []>} : vector<8x16xbf16>, vector<16x16xbf16>, vector<8x16xf32> -> vector<8x16xf32>
    %cst_57 = arith.constant 0.000000e+00 : f32
    %102 = vector.broadcast %cst_57 : f32 to vector<8x16xf32>
    %103 = arith.cmpf ogt, %101, %102 : vector<8x16xf32>
    %104 = math.exp %101 : vector<8x16xf32>
    %cst_58 = arith.constant 1.000000e+00 : f32
    %105 = vector.broadcast %cst_58 : f32 to vector<8x16xf32>
    %106 = arith.subf %104, %105 : vector<8x16xf32>
    %107 = arith.select %103, %101, %106 : vector<8x16xi1>, vector<8x16xf32>
    %108 = arith.addf %71, %107 : vector<8x16xf32>
    %cst_59 = arith.constant 5.000000e-01 : f32
    %109 = vector.broadcast %cst_59 : f32 to vector<8x16xf32>
    %110 = arith.mulf %108, %109 : vector<8x16xf32>
    %c0_60 = arith.constant 0 : index
    %c0_61 = arith.constant 0 : index
    %111 = vector.load %arg10[%c0_60, %c0_61] : memref<8x16xf32, #tpu.memory_space<vmem>>, vector<8x16xf32>
    tpu.vector_store %arg10[%c0_60, %c0_61], %110 {strides = array<i32>} : memref<8x16xf32, #tpu.memory_space<vmem>>, vector<8x16xf32>,
    return
  }
}

</mosaic_0001>

<bundles_post_ra>
// kernel: fairac_forward.1
= control target key start
LH: loop header
LB: loop body
LE: loop exit
PB: predicated region body
PF: predicated region fallthrough
CT: control target
= control target key end

     0   :  { %s1058_s0 = inlined_call_operand.vmem [shape: f32[8,16], index: 0, kind: input, shape index: {}]   ;;  %s1059_s1 = inlined_call_operand.vmem [shape: f32[8,32], index: 1, kind: input, shape index: {}]   ;;  %s1060_s2 = inlined_call_operand.vmem [shape: f32[16,32], index: 2, kind: input, shape index: {}]   ;;  %s1061_s3 = inlined_call_operand.vmem [shape: f32[16,32], index: 3, kind: input, shape index: {}]   ;;  %s1062_s4 = inlined_call_operand.vmem [shape: f32[32,16], index: 4, kind: input, shape index: {}]   ;;  %s1063_s5 = inlined_call_operand.vmem [shape: f32[1,16], index: 5, kind: input, shape index: {}]   ;;  %s1064_s6 = inlined_call_operand.vmem [shape: f32[16,1], index: 6, kind: input, shape index: {}]   ;;  %s1065_s7 = inlined_call_operand.<no memory space> [shape: f32[1,1], index: 7, kind: input, shape index: {}]   ;;  %s1066_s8 = inlined_call_operand.vmem [shape: f32[32,64], index: 8, kind: input, shape index: {}]   ;;  %s1067_s9 = inlined_call_operand.vmem [shape: f32[2,32,32], index: 9, kind: input, shape index: {}]   ;;  %s1068_s10 = inlined_call_operand.hbm [shape: f32[8,16], index: 10, kind: output, shape index: {0}]   ;;  %s1069_s11 = inlined_call_operand.vmem [shape: f32[16,1], index: 11, kind: output, shape index: {1}]   ;;  %s1070_s12 = inlined_call_operand.hbm [shape: f32[16,16], index: 12, kind: output, shape index: {2}]  }
   0x1   :  { %v18_v0 = vstv %s1065_s7 }
   0x2   :  { %19 = vst [vmem:[#allocation3] sm:$0x1] %v18_v0 }
   0x3   :  { %20 = vsyncpa [#allocation5], 0  ;;  %v45_v1 = vld [vmem:[%s1062_s4] sm:$0xff]  ;;  %v46_v2 = vld [vmem:[%s1062_s4 + $0x8] sm:$0xff]  ;;  %v819_v4 = vmov 0.0   ;;  %vm820_vm0 = vmmov 0  }
   0x4   :  { %v47_v3 = vld [vmem:[%s1062_s4 + $0x10] sm:$0xff]  ;;  %681 = vmatprep.subr.bf16.mxu0 %v819_v4  ;;  %v50_v5 = vpack.c.bf16 %v46_v2, %v45_v1  ;;  %v48_v6 = vld [vmem:[%s1062_s4 + $0x18] sm:$0xff]  ;;  %685 = vmatprep.mubr.msk.bf16.mxu0 %vm820_vm0, %v819_v4  ;;  %v43_v8 = vld [vmem:[%s1061_s3] sm:$0xff] }
   0x5   :  { %689 = vmatprep.subr.bf16.mxu1 %v819_v4  ;;  %691 = vmatprep.mubr.msk.bf16.mxu1 %vm820_vm0, %v819_v4  ;;  %v51_v7 = vpack.c.bf16 %v48_v6, %v47_v3  ;;  %v44_v9 = vld [vmem:[%s1061_s3 + $0x8] sm:$0xff]  ;;  %v172_v10 = vld [vmem:[%s1066_s8] sm:$0xff] }
   0x6   :  { %682 = vmatpush3.bf16.msra.mxu0 %v50_v5  ;;  %v173_v11 = vld [vmem:[%s1066_s8 + $0x8] sm:$0xff] }
   0x7   :  { %683 = vmatprep.subr.bf16.mxu0 %v819_v4 }
   0x8   :  { %21 = vsyncpa [#allocation7], 0  ;;  %v49_v12 = vpack.c.bf16 %v44_v9, %v43_v8  ;;  %vm59_vm1 = vcmask 261120   ;;  %v177_v13 = vpack.c.bf16 %v173_v11, %v172_v10  ;;  %v174_v14 = vld [vmem:[%s1066_s8 + $0x10] sm:$0xff]  ;;  %v175_v15 = vld [vmem:[%s1066_s8 + $0x18] sm:$0xff]  ;;  %vm104_vm2 = vcmask 130048  }
   0x9   :  { %v178_v16 = vpack.c.bf16 %v175_v15, %v174_v14  ;;  %v223_v17 = vld [vmem:[%s1059_s1] sm:$0xff]  ;;  %v110_v20 = vld [vmem:[%s1064_s6 + $0x8] sm:$0xff]  ;;  %s821_s15 = smov 96   ;;  %v270_v41 = vld [vmem:[%s1067_s9 + $0x10] sm:$0xff]  ;;  %vm164_vm3 = vcmask 7168  }
   0xa   :  { %684 = vmatpush3.bf16.msra.mxu0 %v51_v7  ;;  %v224_v18 = vpack.c.bf16 %v223_v17, %v223_v17  ;;  %v109_v19 = vld [vmem:[%s1064_s6] sm:$0xff]  ;;  %v171_v31 = vld [vmem:[%s1060_s2 + $0x8] sm:$0xff]  ;;  %v271_v42 = vld [vmem:[%s1067_s9 + $0x18] sm:$0xff] }
   0xb   :  { %703 = vmatprep.subr.bf16.mxu0 %v819_v4  ;;  %v112_v21 = vpack.c.bf16 %v110_v20, %v109_v19  ;;  %v638_v22 = vld [vmem:[%s1063_s5] ss:$0 sm:$0xff]  ;;  %v269_v34 = vld [vmem:[%s1067_s9 + $0x8] sm:$0xff]  ;;  %v274_v43 = vpack.c.bf16 %v271_v42, %v270_v41  ;;  %v640_v47 = vld [vmem:[#allocation3] ss:$0 sm:$0xff] }
   0xc   :  { %v170_v30 = vld [vmem:[%s1060_s2] sm:$0xff]  ;;  %v649_v61 = vld [vmem:[%s1067_s9 + $0x28] sm:$0xff]  ;;  %v650_v5 = vld [vmem:[%s1067_s9 + $0x30] sm:$0xff] }
   0xd   :  { %686 = vmatmul.mubr.msk.bf16.vlgmr.msra.gmra.mrb[0].mxu0 %vm59_vm1, %v49_v12  ;;  %690 = vmatpush3.bf16.msra.mxu1 %v112_v21  ;;  %v268_v33 = vld [vmem:[%s1067_s9] sm:$0xff]  ;;  %v176_v38 = vpack.c.bf16 %v171_v31, %v170_v30  ;;  %v651_v6 = vld [vmem:[%s1067_s9 + $0x38] sm:$0xff] }
   0xe   :  { %704 = vmatpush3.bf16.msra.mxu0 %v177_v13  ;;  %707 = vmatprep.mubr.msk.bf16.mxu0 %vm820_vm0, %v819_v4  ;;  %v273_v40 = vpack.c.bf16 %v269_v34, %v268_v33  ;;  %v648_v60 = vld [vmem:[%s1067_s9 + $0x20] sm:$0xff]  ;;  %v440_v7 = vpack.c.bf16 %v651_v6, %v650_v5 }
   0xf   :  { %705 = vmatprep.subr.bf16.mxu0 %v819_v4  ;;  %695 = vmatprep.subr.bf16.mxu1 %v819_v4  ;;  %v439_v2 = vpack.c.bf16 %v649_v61, %v648_v60  ;;  %v167_v9 = vld [vmem:[%s1058_s0] sm:$0xff]  ;;  %s823_s0 = smov [#allocation6]  }
  0x10   :  { %vm168_vm4 = vcmp.gt.f32.partialorder %v167_v9, 0.0  ;;  %s621_s27 = sshll.u32 %s823_s0, 4  ;;  %s622_s27 = int_to_ptr.vmem [resolvable:$true] %s621_s27 }
  0x11   :  { %s771_s5 = scalar_lea.vmem %s622_s27, 256  ;;  %p776_p1 = scmp.lt.s32.totalorder %s622_s27, %s622_s27 }
  0x12   :  { %706 = vmatpush3.bf16.msra.mxu0 %v178_v16  ;;  %p772_p0 = scmp.ne.s32.totalorder %s622_s27, %s771_s5  ;;  %p777_p2 = scmp.lt.s32.totalorder %s771_s5, %s771_s5 }
  0x13   :  { %719 = vmatprep.subr.bf16.mxu0 %v819_v4 }
  0x14   :  { %p778_p3 = por %p777_p2, %p776_p1 }
  0x15   :  { %708 = vmatmul.mubr.msk.bf16.vlgmr.msra.gmra.mrb[4].mxu0 %vm59_vm1, %v224_v18 }
  0x16   :  { %721 = vmatprep.mubr.msk.bf16.mxu0 %vm820_vm0, %v819_v4  ;;  %p779_p4 = pnand %p778_p3, %p772_p0 }
  0xe0   :  { %v97_v23 = vpop.f32.mrb[0].mxu0 }
  0xe1   :  { %v98_v24 = vadd.f32 %v638_v22, %v97_v23  ;;  %v687_v25 = vpop.f32.mrb[1].mxu0 }
  0xe2   :  { %v100_v26 = vpop.f32.mrb[2].mxu0 }
  0xe3   :  { %105 = vst.msk [vmem:[#allocation2] sm:$0xff] %vm104_vm2, %v98_v24  ;;  %107 = vst.msk [vmem:[#allocation6] sm:$0xff] %vm104_vm2, %v98_v24  ;;  %v101_v27 = vadd.f32 %v638_v22, %v100_v26  ;;  %v688_v28 = vpop.f32.mrb[3].mxu0 }
  0xe5   :  { %106 = vst.msk [vmem:[#allocation2 + $0x8] sm:$0xff] %vm104_vm2, %v101_v27  ;;  %108 = vst.msk [vmem:[#allocation6 + $0x8] sm:$0xff] %vm104_vm2, %v101_v27  ;;  %v111_v29 = vpack.c.bf16 %v101_v27, %v98_v24 }
  0xe7   :  { %692 = vmatmul.mubr.msk.bf16.vlgmr.msra.gmra.mrb[0].mxu1 %vm104_vm2, %v111_v29 }
  0xe8   :  { %696 = vmatpush3.bf16.msra.mxu1 %v177_v13  ;;  %699 = vmatprep.mubr.msk.bf16.mxu1 %vm820_vm0, %v819_v4  ;;  %v262_v32 = vpop.f32.mrb[4].mxu0  ;;  %v822_v13 = vmov -9e+15  }
  0xe9   :  { %697 = vmatprep.subr.bf16.mxu1 %v819_v4  ;;  %v272_v35 = vpack.c.bf16 %v262_v32, %v262_v32  ;;  %v709_v36 = vpop.f32.mrb[5].mxu0  ;;  %v169_v14 = vsel %vm168_vm4, 0.0, %v822_v13 }
  0xea   :  { %v265_v37 = vpop.f32.mrb[6].mxu0  ;;  %v381_v45 = vld [vmem:[#allocation2] sm:$0xff] }
  0xeb   :  { %v710_v39 = vpop.f32.mrb[7].mxu0  ;;  %442 = vrot.lane.b32.xlu0 %v272_v35, %s821_s15 }
  0xec   :  { %698 = vmatpush3.bf16.msra.mxu1 %v178_v16  ;;  %v382_v44 = vld [vmem:[#allocation2 + $0x8] sm:$0xff] }
  0xed   :  { %711 = vmatprep.subr.bf16.mxu1 %v819_v4  ;;  %v384_v46 = vpack.c.bf16 %v382_v44, %v381_v45 }
  0xef   :  { %700 = vmatmul.mubr.msk.bf16.vlgmr.msra.gmra.mrb[4].mxu1 %vm59_vm1, %v176_v38 }
  0xf0   :  { %712 = vmatpush3.bf16.msra.mxu1 %v273_v40  ;;  %715 = vmatprep.mubr.msk.bf16.mxu1 %vm820_vm0, %v819_v4 }
  0xf1   :  { %713 = vmatprep.subr.bf16.mxu1 %v819_v4 }
  0xf4   :  { %714 = vmatpush3.bf16.msra.mxu1 %v274_v43 }
  0xf5   :  { %725 = vmatprep.subr.bf16.mxu1 %v819_v4 }
  0xf7   :  { %716 = vmatmul.mubr.msk.bf16.vlgmr.msra.gmra.mrb[8].mxu1 %vm59_vm1, %v272_v35 }
  0xf8   :  { %726 = vmatpush3.bf16.msra.mxu1 %v384_v46  ;;  %727 = vmatprep.mubr.msk.bf16.mxu1 %vm820_vm0, %v819_v4 }
  0xf9   :  { %739 = vmatprep.subr.bf16.mxu1 %v819_v4 }
 0x15d   :  { %v443_v8 = vpop.permute.xlu0 %442 }
 0x1ba   :  { %v157_v48 = vpop.f32.mrb[0].mxu1 }
 0x1bb   :  { %v158_v49 = vadd.f32 %v640_v47, %v157_v48  ;;  %v693_v50 = vpop.f32.mrb[1].mxu1 }
 0x1bc   :  { %v160_v51 = vpop.f32.mrb[2].mxu1 }
 0x1bd   :  { %165 = vst.msk [vmem:[%s1069_s11] sm:$0xff] %vm164_vm3, %v158_v49  ;;  %v161_v52 = vadd.f32 %v640_v47, %v160_v51  ;;  %v694_v53 = vpop.f32.mrb[3].mxu1 }
 0x1bf   :  { %166 = vst.msk [vmem:[%s1069_s11 + $0x8] sm:$0xff] %vm164_vm3, %v161_v52 }
 0x1c2   :  { %v216_v54 = vpop.f32.mrb[4].mxu1 }
 0x1c3   :  { %v701_v55 = vpop.f32.mrb[5].mxu1 }
 0x1c4   :  { %v219_v56 = vpop.f32.mrb[6].mxu1 }
 0x1c5   :  { %v319_v57 = vpack.c.bf16 %v219_v56, %v216_v54  ;;  %v702_v58 = vpop.f32.mrb[7].mxu1 }
 0x1c7   :  { %v324_v59 = vsel %vm59_vm1, %v319_v57, 0 }
 0x1c8   :  { %720 = vmatpush3.bf16.xpose.msra.mxu0 %v324_v59 }
 0x1c9   :  { %731 = vmatprep.subr.bf16.mxu0 %v819_v4 }
 0x1ca   :  { %v312_v62 = vpop.f32.mrb[8].mxu1 }
 0x1cb   :  { %v318_v63 = vpack.c.bf16 %v312_v62, %v312_v62  ;;  %v717_v0 = vpop.f32.mrb[9].mxu1 }
 0x1cc   :  { %v315_v1 = vpop.f32.mrb[10].mxu1 }
 0x1cd   :  { %v718_v3 = vpop.f32.mrb[11].mxu1 }
 0x1cf   :  { %722 = vmatmul.mubr.msk.bf16.vlgmr.msra.gmra.mrb[8].mxu0 %vm59_vm1, %v318_v63 }
 0x1d0   :  { %732 = vmatpush3.bf16.msra.mxu0 %v439_v2  ;;  %735 = vmatprep.mubr.msk.bf16.mxu0 %vm820_vm0, %v819_v4 }
 0x1d1   :  { %733 = vmatprep.subr.bf16.mxu0 %v819_v4 }
 0x1d4   :  { %734 = vmatpush3.bf16.msra.mxu0 %v440_v7 }
 0x1d5   :  { %745 = vmatprep.subr.bf16.mxu0 %v819_v4 }
 0x1d7   :  { %736 = vmatmul.mubr.msk.bf16.vlgmr.msra.gmra.mrb[12].mxu0 %vm59_vm1, %v443_v8 }
 0x1d8   :  { %746 = vmatpush3.bf16.msra.mxu0 %v384_v46  ;;  %747 = vmatprep.mubr.msk.bf16.mxu0 %vm820_vm0, %v819_v4 }
 0x2a2   :  { %v360_v10 = vpop.f32.mrb[8].mxu0 }
 0x2a3   :  { %vm366_vm5 = vcmp.gt.f32.partialorder %v360_v10, 0.0  ;;  %v367_v11 = vmul.f32 0.2, %v360_v10  ;;  %v723_v12 = vpop.f32.mrb[9].mxu0 }
 0x2a4   :  { %v363_v15 = vpop.f32.mrb[10].mxu0 }
 0x2a5   :  { %v724_v16 = vpop.f32.mrb[11].mxu0  ;;  %v368_v17 = vsel %vm366_vm5, %v360_v10, %v367_v11 }
 0x2a6   :  { %v369_v18 = vadd.f32 %v368_v17, %v169_v14 }
 0x2a8   :  { %v370_v19 = vsel %vm104_vm2, %v369_v18, -inf }
 0x2a9   :  { %371 = vmax.xlane.f32.xlu0 %v370_v19 }
 0x2aa   :  { %v481_v20 = vpop.f32.mrb[12].mxu0 }
 0x2ab   :  { %v737_v21 = vpop.f32.mrb[13].mxu0  ;;  %v487_v35 = vpack.c.bf16 %v481_v20, %v481_v20 }
 0x2ac   :  { %v484_v22 = vpop.f32.mrb[14].mxu0 }
 0x2ad   :  { %v738_v23 = vpop.f32.mrb[15].mxu0 }
 0x336   :  { %v372_v24 = vpop.xlane.xlu0 %371 }
 0x337   :  { %v373_v25 = vsub.f32 %v369_v18, %v372_v24 }
 0x339   :  { %v374_v26 = vmul.f32 1.442695, %v373_v25 }
 0x33b   :  { %759 = vpow2.f32 %v374_v26 }
 0x345   :  { %v760_v27 = vpop.eup %759 }
 0x346   :  { %v376_v28 = vsel %vm104_vm2, %v760_v27, 0.0 }
 0x347   :  { %377 = vadd.xlane.f32.xlu1 %v376_v28 }
 0x358   :  { %489 = vrot.lane.b32.xlu1 %v319_v57, %s821_s15 }
 0x3d4   :  { %v378_v29 = vpop.xlane.xlu1 %377 }
 0x3d5   :  { %761 = vrcp.f32 %v378_v29 }
 0x3d8   :  { %v490_v32 = vpop.permute.xlu1 %489 }
 0x3d9   :  { %v495_v34 = vsel %vm59_vm1, %v490_v32, 0 }
 0x3df   :  { %v762_v30 = vpop.eup %761 }
 0x3e0   :  { %v380_v31 = vmul.f32 %v762_v30, %v760_v27 }
 0x3e2   :  { %v383_v33 = vpack.c.bf16 %v380_v31, %v380_v31 }
 0x3e4   :  { %728 = vmatmul.mubr.msk.bf16.vlgmr.msra.gmra.mrb[12].mxu1 %vm104_vm2, %v383_v33 }
 0x3e5   :  { %740 = vmatpush3.bf16.xpose.msra.mxu1 %v495_v34  ;;  %741 = vmatprep.mubr.msk.bf16.mxu1 %vm820_vm0, %v819_v4 }
 0x3ec   :  { %742 = vmatmul.mubr.msk.bf16.vlgmr.msra.gmra.mrb[16].mxu1 %vm59_vm1, %v487_v35 }
 0x4b7   :  { %v422_v36 = vpop.f32.mrb[12].mxu1 }
 0x4b8   :  { %v729_v37 = vpop.f32.mrb[13].mxu1 }
 0x4b9   :  { %v425_v38 = vpop.f32.mrb[14].mxu1 }
 0x4ba   :  { %v730_v39 = vpop.f32.mrb[15].mxu1 }
 0x4bf   :  { %v531_v40 = vpop.f32.mrb[16].mxu1 }
 0x4c0   :  { %vm537_vm6 = vcmp.gt.f32.partialorder %v531_v40, 0.0  ;;  %v538_v41 = vmul.f32 0.2, %v531_v40  ;;  %v743_v42 = vpop.f32.mrb[17].mxu1 }
 0x4c1   :  { %v534_v43 = vpop.f32.mrb[18].mxu1 }
 0x4c2   :  { %v744_v44 = vpop.f32.mrb[19].mxu1  ;;  %v539_v45 = vsel %vm537_vm6, %v531_v40, %v538_v41 }
 0x4c3   :  { %v540_v46 = vadd.f32 %v539_v45, %v169_v14 }
 0x4c5   :  { %v541_v47 = vsel %vm104_vm2, %v540_v46, -inf }
 0x4c6   :  { %542 = vmax.xlane.f32.xlu1 %v541_v47 }
 0x553   :  { %v543_v48 = vpop.xlane.xlu1 %542 }
 0x554   :  { %v544_v4 = vsub.f32 %v540_v46, %v543_v48 }
 0x556   :  { %v545_v49 = vmul.f32 1.442695, %v544_v4 }
 0x558   :  { %763 = vpow2.f32 %v545_v49 }
 0x562   :  { %v764_v50 = vpop.eup %763 }
 0x563   :  { %v547_v51 = vsel %vm104_vm2, %v764_v50, 0.0 }
 0x564   :  { %548 = vadd.xlane.f32.xlu0 %v547_v51 }
 0x5f1   :  { %v549_v52 = vpop.xlane.xlu0 %548 }
 0x5f2   :  { %765 = vrcp.f32 %v549_v52 }
 0x5fc   :  { %v766_v53 = vpop.eup %765 }
 0x5fd   :  { %v551_v54 = vmul.f32 %v766_v53, %v764_v50 }
 0x5ff   :  { %v552_v55 = vpack.c.bf16 %v551_v54, %v551_v54 }
 0x601   :  { %748 = vmatmul.mubr.msk.bf16.vlgmr.msra.gmra.mrb[16].mxu0 %vm104_vm2, %v552_v55 }
 0x602   :  { %782 = shalt.err (!%p779_p4)
}
 0x603   :  { %s783_s29 = scalar_lea.hbm %s1070_s12, 256 }
 0x604   :  { %p784_p5 = scmp.ne.s32.totalorder %s1070_s12, %s783_s29  ;;  %p787_p6 = scmp.lt.u32.totalorder %s783_s29, %s1070_s12 }
 0x606   :  { %p789_p7 = pnand %p787_p6, %p784_p5 }
 0x608   :  { %792 = shalt.err (!%p789_p7)
}
 0x609   :  { %s824_s15 = smov 128   ;;  %s825_s2 = smov 8   ;;  %v429_v56 = vmul.f32 1.442695, %v422_v36  ;;  %vm428_vm7 = vcmp.gt.f32.partialorder %v422_v36, 0.0 }
 0x60a   :  { %627 = dma.vmem_to_hbm [thread:$0]  %s622_s27, 256, %s1070_s12, [#allocation7], %s824_s15, %s824_s15, %s825_s2  }
 0x60b   :  { %767 = vpow2.f32 %v429_v56  ;;  %s826_s17 = smov [#allocation4]  }
 0x60c   :  { %s610_s18 = sshll.u32 %s826_s17, 4  ;;  %s611_s18 = int_to_ptr.vmem [resolvable:$true] %s610_s18 }
 0x60d   :  { %s793_s12 = scalar_lea.vmem %s611_s18, 128  ;;  %p798_p9 = scmp.lt.s32.totalorder %s611_s18, %s611_s18 }
 0x60e   :  { %p794_p8 = scmp.ne.s32.totalorder %s611_s18, %s793_s12  ;;  %p799_p10 = scmp.lt.s32.totalorder %s793_s12, %s793_s12 }
 0x610   :  { %p800_p11 = por %p799_p10, %p798_p9 }
 0x612   :  { %p801_p12 = pnand %p800_p11, %p794_p8 }
 0x615   :  { %v768_v62 = vpop.eup %767 }
 0x616   :  { %v647_v63 = vadd.f32 -1.0, %v768_v62 }
 0x618   :  { %v432_v2 = vsel %vm428_vm7, %v422_v36, %v647_v63 }
 0x6d4   :  { %v590_v57 = vpop.f32.mrb[16].mxu0 }
 0x6d5   :  { %v597_v58 = vmul.f32 1.442695, %v590_v57  ;;  %v749_v59 = vpop.f32.mrb[17].mxu0  ;;  %vm596_vm8 = vcmp.gt.f32.partialorder %v590_v57, 0.0 }
 0x6d6   :  { %v593_v60 = vpop.f32.mrb[18].mxu0 }
 0x6d7   :  { %769 = vpow2.f32 %v597_v58  ;;  %v750_v61 = vpop.f32.mrb[19].mxu0 }
 0x6e1   :  { %v770_v0 = vpop.eup %769 }
 0x6e2   :  { %v655_v1 = vadd.f32 -1.0, %v770_v0 }
 0x6e4   :  { %v600_v3 = vsel %vm596_vm8, %v590_v57, %v655_v1 }
 0x6e5   :  { %v601_v5 = vadd.f32 %v600_v3, %v432_v2 }
 0x6e7   :  { %v602_v6 = vmul.f32 0.5, %v601_v5 }
 0x6e9   :  { %603 = vst.msk [vmem:[#allocation4] sm:$0xff] %vm104_vm2, %v602_v6 }
 0x6ea   :  { %804 = shalt.err (!%p801_p12)
}
 0x6eb   :  { %s805_s3 = scalar_lea.hbm %s1068_s10, 128 }
 0x6ec   :  { %p806_p13 = scmp.ne.s32.totalorder %s1068_s10, %s805_s3  ;;  %p809_p0 = scmp.lt.u32.totalorder %s805_s3, %s1068_s10 }
 0x6ee   :  { %p811_p1 = pnand %p809_p0, %p806_p13 }
 0x6f0   :  { %814 = shalt.err (!%p811_p1)
}
 0x6f1   :  { %613 = dma.vmem_to_hbm [thread:$0]  %s611_s18, 128, %s1068_s10, [#allocation5]  }
 0x6f2   :  { %815 = dma.done.wait [#allocation5], 128  }
 0x6f3   :  { %816 = vsyncadd [#allocation5], 4294967168 }
 0x6f4   :  { %817 = dma.done.wait [#allocation7], 256  }
 0x6f5   :  { %818 = vsyncadd [#allocation7], 4294967040 }
 0x6f6   :  { %636 = vsyncpa [#allocation5], 1 }
 0x6f7   :  { %637 = vsyncpa [#allocation7], 1 }

</bundles_post_ra>
